<compile_context>
chip_gen: v7x
topology: tpu7x:2x2x1
jax: 0.10.0
libtpu: 0.0.40
codegen_flags: <defaults>
</compile_context>

<pallas_src>
from typing import NamedTuple, Optional

import jax
import jax.numpy as jnp
from jax import lax
from jax.experimental import pallas as pl
from jax.experimental.pallas import tpu as pltpu


def _round_up(x: int, m: int) -> int:
    return ((x + m - 1) // m) * m


class CombinedTable(NamedTuple):
    """Pre-built block-diagonal embedding table + static metadata."""
    table: jax.Array          # (V_pad, C_pad), block-diagonal
    vocab_sizes: tuple        # (Vs, Vw, Vy)
    emb_dim: int              # E
    c: int                    # 3 * E (true concat width)


def build_combined_table(stress_table, wb_table, syll_table,
                         dtype=None) -> CombinedTable:
    """Build the block-diagonal combined table ONCE (hoisted out of the
    per-call wrapper per the performance review).  Pass dtype=jnp.bfloat16
    for the bf16 MXU path on v6e/v7x."""
    E = stress_table.shape[1]
    Vs, Vw, Vy = stress_table.shape[0], wb_table.shape[0], syll_table.shape[0]
    C = 3 * E
    C_pad = _round_up(C, 128)               # lane-dense output width
    V_total = Vs + Vw + Vy
    V_pad = _round_up(V_total, 128)         # lane-dense one-hot width

    if dtype is None:
        dtype = stress_table.dtype
    table = jnp.zeros((V_pad, C_pad), dtype=dtype)
    table = table.at[:Vs, 0:E].set(stress_table.astype(dtype))
    table = table.at[Vs:Vs + Vw, E:2 * E].set(wb_table.astype(dtype))
    table = table.at[Vs + Vw:V_total, 2 * E:3 * E].set(syll_table.astype(dtype))
    # padding_idx=PAD=0 semantics rely on row 0 of each source table being
    # zero (true for torch-initialized / torch-loaded Embedding weights).
    return CombinedTable(table=table, vocab_sizes=(Vs, Vw, Vy), emb_dim=E, c=C)


def tagger_pack_kernel(ids_ref,   # (TILE_M, 3) int32, pre-offset ids, -1 = pad
                       tab_ref,   # (V_pad, C_pad) combined block-diag table
                       out_ref):  # (TILE_M, C_pad)
    tile_m = ids_ref.shape[0]
    v_pad = tab_ref.shape[0]

    # Vocab on the lane axis -> lane-dense compares and MXU LHS.
    iota_v = lax.broadcasted_iota(jnp.int32, (tile_m, v_pad), 1)
    ids = ids_ref[...]

    # "Three-hot": the three vocab blocks are disjoint, so OR of the three
    # compares selects exactly the three rows whose concat we want.
    # Sentinel id -1 (padded positions) never matches -> zero output row,
    # folding the length mask into the one-hot construction.
    three_hot = ((iota_v == ids[:, 0:1]) |
                 (iota_v == ids[:, 1:2]) |
                 (iota_v == ids[:, 2:3])).astype(tab_ref.dtype)

    # Single matmul: (TILE_M, V_pad) x (V_pad, C_pad) -> (TILE_M, C_pad),
    # already the concatenated [stress | wb | syll] embedding slab.
    out_ref[...] = jnp.dot(
        three_hot, tab_ref[...], preferred_element_type=jnp.float32
    ).astype(out_ref.dtype)


def tagger_pack(stress, wb, syllables, lengths, combined: CombinedTable,
                *, out_dtype: Optional[jnp.dtype] = None,
                keep_padded: bool = False):
    B, T = stress.shape
    Vs, Vw, _ = combined.vocab_sizes
    table = combined.table
    V_pad, C_pad = table.shape
    C = combined.c
    if out_dtype is None:
        out_dtype = table.dtype     # bf16 table -> bf16 output (v6e/v7x path)

    # --- id prep: one merged (M_pad, 3) int32 tensor (single DMA per step) ---
    # Offsets into the block-diagonal table + length mask fold into a single
    # fused elementwise expression; sentinel -1 marks rows that
    # pack_padded_sequence would drop.
    offsets = jnp.array([0, Vs, Vs + Vw], dtype=jnp.int32)
    valid = jnp.arange(T, dtype=jnp.int32)[None, :] < lengths[:, None]
    ids = jnp.stack([stress, wb, syllables], axis=-1).astype(jnp.int32) + offsets
    ids = jnp.where(valid[:, :, None], ids, -1)

    # Flatten (B, T) -> M; pick TILE_M up to 512 (amortizes ~0.35us/step) but
    # keep >= 2 grid steps when possible so v7x's 2 TensorCores both get work.
    M = B * T
    TILE_M = min(512, _round_up(M, 8))
    if M > 8 and -(-M // TILE_M) < 2:
        TILE_M = max(8, _round_up(-(-M // 2), 8))
    M_pad = _round_up(M, TILE_M)

    ids = ids.reshape(M, 3)
    ids = jnp.pad(ids, ((0, M_pad - M), (0, 0)), constant_values=-1)

    grid_spec = pl.GridSpec(
        grid=(M_pad // TILE_M,),
        in_specs=[
            pl.BlockSpec((TILE_M, 3), lambda i: (i, 0)),
            # Grid-invariant table: single-buffered (no pointless 2x VMEM).
            pl.BlockSpec((V_pad, C_pad), lambda i: (0, 0),
                         pipeline_mode=pl.Buffered(1)),
        ],
        out_specs=pl.BlockSpec((TILE_M, C_pad), lambda i: (i, 0)),
    )

    out = pl.pallas_call(
        tagger_pack_kernel,
        out_shape=jax.ShapeDtypeStruct((M_pad, C_pad), out_dtype),
        grid_spec=grid_spec,
        compiler_params=pltpu.CompilerParams(
            dimension_semantics=("parallel",)),
    )(ids, table)

    if keep_padded:
        # Lane-dense slab (trailing C_pad - C cols are zero); avoids the
        # unaligned slice + reshape HBM round-trip when the consumer can take it.
        return out[:M].reshape(B, T, C_pad)
    # Layout plumbing: drop padding, restore (B, T, 3E).
    return out[:M, :C].reshape(B, T, C)


def tagger_pack_reference(stress, wb, syllables, lengths,
                          stress_table, wb_table, syll_table):
    s = jnp.take(stress_table, stress, axis=0)
    w = jnp.take(wb_table, wb, axis=0)
    y = jnp.take(syll_table, syllables, axis=0)
    embs = jnp.concatenate([s, w, y], axis=2)
    T = stress.shape[1]
    mask = (jnp.arange(T)[None, :] < lengths[:, None]).astype(jnp.float32)
    return embs * mask[:, :, None]


if __name__ == "__main__":
    key = jax.random.PRNGKey(0)
    B, T = 2, 8
    embedding_dim = 32
    stress_size = 8
    wb_size = 8
    syll_vocab = 64

    k1, k2, k3, k4, k5, k6 = jax.random.split(key, 6)

    # Deterministic parameter init; row 0 zeroed (padding_idx=PAD=0).
    def make_table(k, V, E):
        tab = jax.random.normal(k, (V, E), dtype=jnp.float32) * 0.1
        return tab.at[0].set(0.0)

    stress_table = make_table(k1, stress_size, embedding_dim)
    wb_table = make_table(k2, wb_size, embedding_dim)
    syll_table = make_table(k3, syll_vocab, embedding_dim)

    # Lengths sorted descending (pack_padded_sequence convention).
    lengths = jnp.array([8, 5], dtype=jnp.int32)

    stress = jax.random.randint(k4, (B, T), 1, stress_size, dtype=jnp.int32)
    wb = jax.random.randint(k5, (B, T), 1, wb_size, dtype=jnp.int32)
    syllables = jax.random.randint(k6, (B, T), 1, syll_vocab, dtype=jnp.int32)

    # Positions past each sequence's length hold PAD=0 tokens.
    pad_mask = jnp.arange(T)[None, :] < lengths[:, None]
    stress = jnp.where(pad_mask, stress, 0)
    wb = jnp.where(pad_mask, wb, 0)
    syllables = jnp.where(pad_mask, syllables, 0)

    ref = tagger_pack_reference(stress, wb, syllables, lengths,
                                stress_table, wb_table, syll_table)

    # f32 path (exact-ish row selection, matches torch f32 Embedding to 1e-5).
    combined_f32 = build_combined_table(stress_table, wb_table, syll_table)
    out = tagger_pack(stress, wb, syllables, lengths, combined_f32)
    out = jax.block_until_ready(out)
    assert out.shape == (B, T, 3 * embedding_dim), out.shape
    assert jnp.allclose(out, ref, atol=1e-5, rtol=1e-5), "f32 mismatch vs ref"

    # bf16 table / bf16 output path (native bf16 MXU on v6e/v7x); one-hot is
    # exact in bf16, table values are bf16-rounded -> looser tolerance.
    combined_bf16 = build_combined_table(stress_table, wb_table, syll_table,
                                         dtype=jnp.bfloat16)
    out_bf16 = tagger_pack(stress, wb, syllables, lengths, combined_bf16)
    out_bf16 = jax.block_until_ready(out_bf16)
    assert out_bf16.dtype == jnp.bfloat16
    assert jnp.allclose(out_bf16.astype(jnp.float32), ref, atol=1e-2), \
        "bf16 mismatch vs ref"

    print("KERNEL_OK")
</pallas_src>

<mosaic_0001>
module attributes {stable_mosaic.version = 11 : i64} {
  func.func @tagger_pack_kernel(%arg0: i32, %arg1: memref<8x3xi32, #tpu.memory_space<vmem>>, %arg2: memref<128x128xf32, #tpu.memory_space<vmem>>, %arg3: memref<8x128xf32, #tpu.memory_space<vmem>>) attributes {dimension_semantics = [#tpu.dimension_semantics<parallel>], iteration_bounds = array<i64: 2>, scalar_prefetch = 0 : i64, scratch_operands = 0 : i64, tpu.core_type = #tpu.core_type<tc>, window_params = [{transform_indices = @transform_0, window_bounds = array<i64: 8, 3>}, {pipeline_mode = #tpu.pipeline_mode<synchronous>, transform_indices = @transform_1, window_bounds = array<i64: 128, 128>}, {transform_indices = @transform_2, window_bounds = array<i64: 8, 128>}]} {
    %0 = tpu.iota {dimensions = array<i32: 1>} : vector<8x128xi32>
    %c0 = arith.constant 0 : index
    %c0_0 = arith.constant 0 : index
    %1 = vector.load %arg1[%c0, %c0_0] : memref<8x3xi32, #tpu.memory_space<vmem>>, vector<8x3xi32>
    %2 = vector.extract_strided_slice %1 {offsets = [0, 0], sizes = [8, 1], strides = [1, 1]} : vector<8x3xi32> to vector<8x1xi32>
    %3 = vector.broadcast %2 : vector<8x1xi32> to vector<8x128xi32>
    %4 = arith.cmpi eq, %0, %3 : vector<8x128xi32>
    %5 = vector.extract_strided_slice %1 {offsets = [0, 1], sizes = [8, 1], strides = [1, 1]} : vector<8x3xi32> to vector<8x1xi32>
    %6 = vector.broadcast %5 : vector<8x1xi32> to vector<8x128xi32>
    %7 = arith.cmpi eq, %0, %6 : vector<8x128xi32>
    %8 = arith.ori %4, %7 : vector<8x128xi1>
    %9 = vector.extract_strided_slice %1 {offsets = [0, 2], sizes = [8, 1], strides = [1, 1]} : vector<8x3xi32> to vector<8x1xi32>
    %10 = vector.broadcast %9 : vector<8x1xi32> to vector<8x128xi32>
    %11 = arith.cmpi eq, %0, %10 : vector<8x128xi32>
    %12 = arith.ori %8, %11 : vector<8x128xi1>
    %13 = arith.extui %12 : vector<8x128xi1> to vector<8x128xi32>
    %14 = arith.sitofp %13 : vector<8x128xi32> to vector<8x128xf32>
    %c0_1 = arith.constant 0 : index
    %c0_2 = arith.constant 0 : index
    %15 = vector.load %arg2[%c0_1, %c0_2] : memref<128x128xf32, #tpu.memory_space<vmem>>, vector<128x128xf32>
    %cst = arith.constant dense<0.000000e+00> : vector<8x128xf32>
    %16 = tpu.matmul %14, %15, %cst {dimension_numbers = #tpu.dot_dimension_numbers<[1], [0], [0], [1], [0, 0, 1, 1], [], []>} : vector<8x128xf32>, vector<128x128xf32>, vector<8x128xf32> -> vector<8x128xf32>
    %c0_3 = arith.constant 0 : index
    %c0_4 = arith.constant 0 : index
    %17 = vector.load %arg3[%c0_3, %c0_4] : memref<8x128xf32, #tpu.memory_space<vmem>>, vector<8x128xf32>
    tpu.vector_store %arg3[%c0_3, %c0_4], %16 {strides = array<i32>} : memref<8x128xf32, #tpu.memory_space<vmem>>, vector<8x128xf32>,
    return
  }
  func.func @transform_0(%arg0: i32) -> (i32, i32) {
    %c0_i32 = arith.constant 0 : i32
    %c0_i32_0 = arith.constant 0 : i32
    return %arg0, %c0_i32 : i32, i32
  }
  func.func @transform_1(%arg0: i32) -> (i32, i32) {
    %c0_i32 = arith.constant 0 : i32
    %c0_i32_0 = arith.constant 0 : i32
    %c0_i32_1 = arith.constant 0 : i32
    return %c0_i32, %c0_i32_0 : i32, i32
  }
  func.func @transform_2(%arg0: i32) -> (i32, i32) {
    %c0_i32 = arith.constant 0 : i32
    %c0_i32_0 = arith.constant 0 : i32
    return %arg0, %c0_i32 : i32, i32
  }
}

</mosaic_0001>

<bundles_post_ra>
// kernel: tpu_custom_call.1
= control target key start
LH: loop header
LB: loop body
LE: loop exit
PB: predicated region body
PF: predicated region fallthrough
CT: control target
= control target key end

     0   :  { %7 = vsyncpa [#allocation3], 0  ;;  %s755_s0 = inlined_call_operand.vmem [shape: s32[16,3], index: 0, kind: input, shape index: {}]   ;;  %s756_s1 = inlined_call_operand.hbm [shape: f32[128,128], index: 1, kind: input, shape index: {}]   ;;  %s757_s2 = inlined_call_operand.hbm [shape: f32[16,128], index: 2, kind: output, shape index: {}]  }
   0x1   :  { %8 = vsyncpa [#allocation4], 0 }
   0x2   :  { %10 = vsyncpa [#allocation4 + $0x1], 0  ;;  %s620_s9 = smov 0   ;;  %s622_s10 = smov 0  }
   0x3   :  { %s624_s11 = smov 0   ;;  %s626_s12 = smov 0  }
   0x4 LB: > { %s641_s13 = sadd.s32 4294967295, %s592_s12   ;;  %s345_s14 = sadd.s32 4294967294, %s592_s12   ;;  %s592_s12 = sphi %s626_s12, %s773_s12   ;;  %s588_s11 = sphi %s624_s11, %s772_s11   ;;  %s584_s10 = sphi %s622_s10, %s771_s10   ;;  %s580_s9 = sphi %s620_s9, %s770_s9  }
   0x5   : > { %s645_s15 = sadd.s32 1, %s592_s12   ;;  %s70_s16 = sadd.s32 1, %s588_s11 }
   0x6   : > { %s67_s17 = ssub.s32 %s592_s12, %s645_s15  ;;  %p80_p0 = scmp.ne.s32.totalorder %s588_s11, %s584_s10 }
   0x7   : > { %p68_p1 = scmp.eq.s32.totalorder %s67_s17, 0  ;;  %p81_p2 = scmp.eq.s32.totalorder %s641_s13, 1 }
   0x8   : > { %p86_p3 = scmp.ne.s32.totalorder %s584_s10, %s580_s9  ;;  %p87_p4 = scmp.eq.s32.totalorder %s345_s14, 1 }
   0x9   : > { %s656_s18 = scalar_select %p68_p1, %s588_s11, %s70_s16  }
   0xa   : > { %p658_p5 = por %p81_p2, %p80_p0  ;;  %p662_p6 = por %p87_p4, %p86_p3 }
   0xb   : > { %p346_p7 = scmp.ge.s32.totalorder %s592_s12, 1  ;;  %p94_p8 = scmp.lt.s32.totalorder %s592_s12, 3 }
   0xc   : > { %s761_s19 = scalar_select %p658_p5, 1, 0 }
   0xd   : > { %s762_s20 = scalar_select %p662_p6, 1, 0 }
   0xe   : > { %p758_p9 = scmp.eq.s32.totalorder %s641_s13, 0  ;;  %p669_p10 = pnand %p346_p7, %p94_p8 }
   0xf   : > { %s594_s22 = smov [#allocation2]   ;;  %s498_s27 = scalar_lea.hbm %s756_s1, 2048 }
  0x10   : > { %s763_s21 = scalar_select %p669_p10, 1, 0 }
  0x11   : > { %s106_s23 = sshll.u32 %s594_s22, 4  ;;  %p441_p11 = pneg %p669_p10  ;;  %s107_s23 = int_to_ptr.vmem [resolvable:$true] %s106_s23 }
  0x12   : > { %p499_p13 = scmp.ne.s32.totalorder %s756_s1, %s498_s27  ;;  %p505_p3 = scmp.lt.u32.totalorder %s498_s27, %s756_s1 }
  0x13   : > { %p677_p12 = pnand %p758_p9, %p441_p11 }
  0x15   : > { %p500_p0 = pneg %p677_p12 }
  0x17   : > { %p501_p1 = pnand %p500_p0, %p499_p13 }
  0x19   : > { %p502_p2 = pneg %p501_p1 }
  0x1b   : > { %p507_p4 = pnand %p505_p3, %p502_p2 }
  0x1d   : > { %510 = shalt.err (!%p507_p4)
}
  0x1e   : > { %s511_s4 = scalar_lea.vmem %s107_s23, 2048  ;;  %p519_p9 = scmp.lt.s32.totalorder %s107_s23, %s107_s23 }
  0x1f   : > { %p512_p7 = scmp.ne.s32.totalorder %s107_s23, %s511_s4  ;;  %p520_p6 = scmp.lt.s32.totalorder %s511_s4, %s511_s4 }
  0x21   : > { %p514_p8 = pnand %p512_p7, %p500_p0  ;;  %p521_p5 = por %p520_p6, %p519_p9 }
  0x23   : > { %p515_p11 = pneg %p514_p8 }
  0x25   : > { %p522_p10 = pnand %p521_p5, %p515_p11 }
  0x27   : > { %525 = shalt.err (!%p522_p10)
}
  0x28   : > { %s595_s5 = smov 128   ;;  %s596_s6 = smov 8  }
  0x29   : > { %444 = dma.hbm_to_vmem [thread:$0]  (!%p677_p12), %s756_s1, 2048, %s107_s23, [#allocation3], %s595_s5, %s595_s5, %s596_s6  }
  0x2a   : > { %p765_p13 = scmp.ne.s32.totalorder %s763_s21, 0 }
  0x2b   : > { %p766_p1 = scmp.eq.s32.totalorder (!%p765_p13), %s641_s13, 0 }
  0x2c   : > { %129 = sbr.rel (%p765_p13) target bundleno = 421 (0x1a5), region = 28 }
  0x33   : > { %571 = dma.done.wait (%p766_p1), [#allocation3], 2048   ;;  %p767_p0 = pmov %p766_p1 }
  0x34   : > { %p150_p5 = scmp.lt.s32.totalorder %s641_s13, 1  ;;  %v597_v0 = vmov 0   ;;  %v598_v1 = vmov 2   ;;  %v599_v2 = vmov 0.0|0.0   ;;  %v173_v4 = vld [vmem:[#allocation2] sm:$0xff]  ;;  %v174_v5 = vld [vmem:[#allocation2 + $0x8] sm:$0xff]  ;;  %v154_v30 = vlaneseq }
  0x35   : > { %573 = vsyncadd (%p767_p0), [#allocation3], 4294965248  ;;  %494 = vset.pattern.permute.xlu0 %v597_v0  ;;  %496 = vset.pattern.permute.xlu1 %v598_v1  ;;  %v412_v6 = vpack.c.bf16 %v174_v5, %v173_v4  ;;  %v175_v7 = vld [vmem:[#allocation2 + $0x10] sm:$0xff]  ;;  %v176_v8 = vld [vmem:[#allocation2 + $0x18] sm:$0xff]  ;;  %v600_v12 = vmov 1   ;;  %vm601_vm0 = vmmov 0  }
  0x36   : > { %s151_s14 = scalar_select %p150_p5, %s641_s13, 1  ;;  %411 = vmatprep.subr.bf16.mxu0 %v599_v2  ;;  %v415_v9 = vpack.c.bf16 %v176_v8, %v175_v7  ;;  %v177_v10 = vld [vmem:[#allocation2 + $0x20] sm:$0xff]  ;;  %v178_v11 = vld [vmem:[#allocation2 + $0x28] sm:$0xff]  ;;  %v179_v14 = vld [vmem:[#allocation2 + $0x30] sm:$0xff]  ;;  %v602_v16 = vmov 0.0   ;;  %v155_v32 = vand.u32 127, %v154_v30 }
  0x37   : > { %413 = vmatpush3.bf16.msra.mxu0 %v412_v6  ;;  %v418_v13 = vpack.c.bf16 %v178_v11, %v177_v10  ;;  %v180_v15 = vld [vmem:[#allocation2 + $0x38] sm:$0xff]  ;;  %408 = vmatprep.mubr.msk.f32.mxu0 %vm601_vm0, %v602_v16  ;;  %v181_v18 = vld [vmem:[#allocation2 + $0x40] sm:$0xff]  ;;  %v182_v19 = vld [vmem:[#allocation2 + $0x48] sm:$0xff]  ;;  %v603_v35 = vmov 1.0   ;;  %s147_s23 = sand.u32 1, %s584_s10   ;;  %s356_s27 = sshll.u32 %s641_s13, 7 }
  0x38   : > { %s352_s16 = sshll.u32 %s151_s14, 3  ;;  %414 = vmatprep.subr.bf16.mxu0 %v599_v2  ;;  %v421_v17 = vpack.c.bf16 %v180_v15, %v179_v14  ;;  %v424_v20 = vpack.c.bf16 %v182_v19, %v181_v18  ;;  %v183_v21 = vld [vmem:[#allocation2 + $0x50] sm:$0xff]  ;;  %v184_v22 = vld [vmem:[#allocation2 + $0x58] sm:$0xff]  ;;  %v185_v24 = vld [vmem:[#allocation2 + $0x60] sm:$0xff]  ;;  %s351_s24 = sshll.u32 %s147_s23, 3 }
  0x39   : > { %s153_s22 = scalar_lea.vmem %s755_s0, %s352_s16  ;;  %v427_v23 = vpack.c.bf16 %v184_v22, %v183_v21  ;;  %v186_v25 = vld [vmem:[#allocation2 + $0x68] sm:$0xff]  ;;  %v187_v27 = vld [vmem:[#allocation2 + $0x70] sm:$0xff]  ;;  %v188_v28 = vld [vmem:[#allocation2 + $0x78] sm:$0xff]  ;;  %s149_s25 = scalar_lea.vmem [#allocation5], %s351_s24 }
  0x3a   : > { %v156_v3 = vld [vmem:[%s153_s22] sm:$0xff]  ;;  %v430_v26 = vpack.c.bf16 %v186_v25, %v185_v24  ;;  %v433_v29 = vpack.c.bf16 %v188_v28, %v187_v27  ;;  %s274_s26 = sshll.u32 %s149_s25, 4  ;;  %s715_s30 = scalar_lea.hbm %s757_s2, %s356_s27  ;;  %s710_s26 = int_to_ptr.vmem [resolvable:$true] %s274_s26 }
  0x3b   : > { %158 = vperm.xlu0 %494, %v156_v3   ;;  %167 = vperm.xlu1 %496, %v156_v3   ;;  %s261_s3 = scalar_lea.sflag [#allocation4], %s147_s23  ;;  %s526_s4 = scalar_lea.vmem %s710_s26, 128 }
  0x3c   : > { %416 = vmatpush3.bf16.msra.mxu0 %v415_v9  ;;  %p527_p6 = scmp.ne.s32.totalorder %s710_s26, %s526_s4  ;;  %p768_p9 = scmp.ne.s32.totalorder %s761_s19, 0 }
  0x3d   : > { %417 = vmatprep.subr.bf16.mxu0 %v599_v2  ;;  %s604_s13 = smov [#allocation5]  }
  0x3e   : > { %p528_p10 = pnand %p527_p6, %p768_p9  ;;  %s530_s5 = sshll.u32 %s604_s13, 4  ;;  %s531_s5 = int_to_ptr.vmem [resolvable:$false] %s530_s5 }
  0x3f   : > { %495 = vset.pattern.permute.xlu0 %v600_v12  ;;  %s532_s6 = scalar_lea.vmem %s531_s5, 256  ;;  %p533_p2 = scmp.lt.s32.totalorder %s710_s26, %s531_s5 }
  0x40   : > { %162 = vperm.xlu0 %495, %v156_v3   ;;  %419 = vmatpush3.bf16.msra.mxu0 %v418_v13  ;;  %p529_p12 = pneg %p528_p10  ;;  %p534_p3 = scmp.lt.s32.totalorder %s532_s6, %s526_s4 }
  0x41   : > { %420 = vmatprep.subr.bf16.mxu0 %v599_v2 }
  0x42   : > { %p535_p4 = por %p534_p3, %p533_p2 }
  0x44   : > { %497 = vset.pattern.permute.xlu0 %v598_v1  ;;  %422 = vmatpush3.bf16.msra.mxu0 %v421_v17  ;;  %p536_p7 = pnand %p535_p4, %p529_p12 }
  0x45   : > { %423 = vmatprep.subr.bf16.mxu0 %v599_v2 }
  0x48   : > { %425 = vmatpush3.bf16.msra.mxu0 %v424_v20 }
  0x49   : > { %426 = vmatprep.subr.bf16.mxu0 %v599_v2 }
  0x4c   : > { %428 = vmatpush3.bf16.msra.mxu0 %v427_v23 }
  0x4d   : > { %429 = vmatprep.subr.bf16.mxu0 %v599_v2 }
  0x50   : > { %431 = vmatpush3.bf16.msra.mxu0 %v430_v26 }
  0x51   : > { %432 = vmatprep.subr.bf16.mxu0 %v599_v2 }
  0x54   : > { %434 = vmatpush3.bf16.msra.mxu0 %v433_v29 }
  0xba   : > { %v159_v31 = vpop.permute.xlu0 %158  ;;  %v168_v33 = vpop.permute.xlu1 %167 }
  0xbb   : > { %vm169_vm1 = vcmp.eq.s32.totalorder %v155_v32, %v168_v33  ;;  %vm160_vm2 = vcmp.eq.s32.totalorder %v155_v32, %v159_v31 }
  0xbf   : > { %v163_v34 = vpop.permute.xlu0 %162 }
  0xc0   : > { %vm164_vm3 = vcmp.eq.s32.totalorder %v155_v32, %v163_v34 }
  0xc1   : > { %vm165_vm4 = vmor %vm160_vm2, %vm164_vm3 }
  0xc2   : > { %vm170_vm5 = vmor %vm165_vm4, %vm169_vm1 }
  0xc3   : > { %409 = vmatmul.mubr.msk.f32.vlgmr.msra.gmra.mrb[0].mxu0 %vm170_vm5, %v603_v35 }
 0x196   : > { %v255_v36 = vpop.f32.mrb[0].mxu0 }
 0x197   : > { %259 = vst [vmem:[%s149_s25] sm:$0xff] %v255_v36  ;;  %v410_v37 = vpop.f32.mrb[1].mxu0 }
 0x198   : > { %539 = shalt.err (!%p536_p7)
}
 0x199   : > { %s540_s7 = scalar_lea.hbm %s715_s30, 128  ;;  %s544_s16 = scalar_lea.hbm %s757_s2, 256 }
 0x19a   : > { %p541_p8 = scmp.ne.s32.totalorder %s715_s30, %s540_s7  ;;  %p545_p1 = scmp.lt.u32.totalorder %s715_s30, %s757_s2 }
 0x19b   : > { %p546_p0 = scmp.lt.u32.totalorder %s544_s16, %s540_s7  ;;  %p548_p6 = scmp.lt.u32.totalorder %s540_s7, %s715_s30 }
 0x19c   : > { %p542_p11 = pnand %p541_p8, %p768_p9 }
 0x19d   : > { %p547_p5 = por %p546_p0, %p545_p1 }
 0x19e   : > { %p543_p13 = pneg %p542_p11 }
 0x19f   : > { %p549_p10 = por %p548_p6, %p547_p5 }
 0x1a1   : > { %p550_p12 = pnand %p549_p10, %p543_p13 }
 0x1a3   : > { %553 = shalt.err (!%p550_p12)
}
 0x1a4   : > { %439 = dma.vmem_to_hbm [thread:$0]  (%p768_p9), %s710_s26, 128, %s715_s30, %s261_s3  }
 0x1a5 PF: > { %p451_p2 = scmp.ge.s32.totalorder %s592_s12, 2  ;;  %s286_s22 = sand.u32 1, %s580_s9  }
 0x1a6   : > { %p769_p3 = scmp.ne.s32.totalorder %s762_s20, 0  ;;  %s287_s23 = scalar_lea.sflag [#allocation4], %s286_s22 }
 0x1a8   : > { %p446_p4 = pnand %p451_p2, %p769_p3 }
 0x1aa   : > { %575 = dma.done.wait (!%p446_p4), %s287_s23, 128  }
 0x1ab   : > { %577 = vsyncadd (!%p446_p4), %s287_s23, 4294967168  ;;  %p13_p7 = scmp.ge.s32.totalorder %s645_s15, 4   ;;  %s770_s9 = smov %s584_s10 }
 0x1ac   : > { %s771_s10 = smov %s588_s11  ;;  %s772_s11 = smov %s656_s18 }
 0x1ad   : > { %s773_s12 = smov %s645_s15  ;;  %15 = sbr.rel (!%p13_p7) target bundleno = 4 (0x4), region = 68 }
 0x1b4   :  { %292 = vsyncpa [#allocation3], 1 }
 0x1b5   :  { %294 = vsyncpa [#allocation3 + $0x1], 1 }
 0x1b6   :  { %295 = vsyncpa [#allocation4], 1 }
 0x1b7   :  { %297 = vsyncpa [#allocation4 + $0x1], 1 }

</bundles_post_ra>
